<compile_context>
chip_gen: v6e
topology: v6e:2x2x1
jax: 0.10.0
libtpu: 0.0.40
codegen_flags: <defaults>
</compile_context>

<pallas_src>
import functools

import jax
import jax.numpy as jnp
from jax import lax
from jax.experimental import pallas as pl
from jax.experimental.pallas import tpu as pltpu

NEG_INF = -1e30
C_PAD = 128  # lane-dense padded width of the lin2 output / weight slab


def politifact_kernel(x_ref, wslab_ref, aux_ref, out_ref, *, F, H, C, N, G, R):
    f32, bf16 = jnp.float32, jnp.bfloat16

    x = x_ref[...]                                    # (N, F) bf16
    aux = aux_ref[...]                                # (8 + 2R, 128) f32

    att_src_w = aux[0:1, :F].astype(bf16)             # (1, F)  = att_src @ W_gat^T
    b_gat = aux[1:2, :H]                              # (1, H)
    b0 = aux[2:3, :H]                                 # (1, H)
    b1 = aux[3:4, :H]                                 # (1, H)
    b2 = aux[4:5, :]                                  # (1, 128) zeros past C
    adj_add = aux[8:8 + N, :N]                        # (N, N) additive mask: 0 edge, -1e30 else
    pmask = aux[8 + R:8 + R + G, :N].astype(bf16)     # (G, N) one-hot pooling mask

    # ---- fused  x @ [W_gat | W0 | W_gat att_dst^T | 0]  (one 128-lane bf16 MXU pass) ----
    xw_all = jnp.dot(x, wslab_ref[0:F, :], preferred_element_type=f32)      # (N, 128)
    xw = xw_all[:, :H]                                                      # GAT-transformed nodes
    h_lin = jnp.maximum(xw_all[:, H:2 * H] + b0, 0.0)                       # lin0(x).relu()
    a_dst = xw_all[:, 2 * H:2 * H + 1]                                      # (N, 1) per-target score

    # ---- per-source scores as a lane row: (att_src W_gat^T) . x^T  (single bf16 MXU pass) ----
    a_src = lax.dot_general(att_src_w, x, (((1,), (1,)), ((), ())),
                            preferred_element_type=f32)                     # (1, N)

    # ---- GATConv attention (single head, negative_slope = 0.2, softmax over sources) ----
    z = a_dst + a_src                                                       # (N, N)
    e = jnp.where(z >= 0, z, 0.2 * z) + adj_add                             # LeakyReLU + edge mask
    m = jnp.max(e, axis=-1, keepdims=True)
    p = jnp.exp(e - m)
    denom = jnp.sum(p, axis=-1, keepdims=True)                              # >= ~1 (self-loops)
    attn = p * pl.reciprocal(denom, approx=True)

    h_conv = jnp.dot(attn.astype(bf16), xw.astype(bf16),
                     preferred_element_type=f32) + b_gat                    # (N, H)
    h_conv = jnp.maximum(h_conv, 0.0)                                       # .relu()

    # ---- global_max_pool: one node per graph => permutation gather == one-hot matmul ----
    h_pool = jnp.dot(pmask, h_conv.astype(bf16), preferred_element_type=f32)  # (G, H)

    # ---- cat([h_pool, h_lin], 1) -> lin1 -> relu  (concat folded into split w1 row-slices) ----
    h1 = (jnp.dot(h_pool.astype(bf16), wslab_ref[F:F + H, :], preferred_element_type=f32)
          + jnp.dot(h_lin.astype(bf16), wslab_ref[F + H:F + 2 * H, :],
                    preferred_element_type=f32))                            # (N, 128)
    h = jnp.maximum(h1[:, :H] + b1, 0.0)                                    # (N, H)

    # ---- lin2 (lane-dense padded output) ----
    out_ref[...] = (jnp.dot(h.astype(bf16), wslab_ref[F + 2 * H:F + 3 * H, :],
                            preferred_element_type=f32) + b2).astype(out_ref.dtype)


def politifact_forward(x, edge_index, batch, params):
    """x: (N, F) f32, edge_index: (2, E) int32 [src; dst], batch: (N,) int32."""
    N, F = x.shape
    H = params["w_gat"].shape[1]
    C = params["w2"].shape[1]
    # The model's cat([h_pool, h_lin], dim=1) requires num_graphs == num_nodes
    # (batch must be a permutation of 0..N-1); derived statically, no host sync.
    G = N
    # TODO(synk): dense single-tile formulation; switch to the flash-style tiled kernel past this.
    assert N <= 128 and G <= 128

    f32, bf16 = jnp.float32, jnp.bfloat16
    R = ((max(N, G) + 7) // 8) * 8

    # Dense adjacency adj[dst, src] = 1, plus self-loops (GATConv default), as an ADDITIVE mask.
    adj = jnp.zeros((N, N), f32)
    adj = adj.at[edge_index[1], edge_index[0]].set(1.0)
    adj = adj.at[jnp.arange(N), jnp.arange(N)].set(1.0)
    adj_add = (adj - 1.0) * -NEG_INF                                         # 0 edge, -1e30 non-edge

    # One-hot pooling mask (one node per graph under the permutation assumption).
    pmask = (batch[None, :] == jnp.arange(G)[:, None]).astype(f32)

    # Lane-dense bf16 weight slab (128 lanes): rows [0:F)   = [W_gat | W0 | W_gat att_dst^T | 0]
    #                                          rows [F:F+2H)= w1 (unsplit, cols padded to 128)
    #                                          rows [F+2H:) = w2 (cols padded to 128)
    w_ad = params["w_gat"] @ params["att_dst"].T                             # (F, 1)
    wf = jnp.zeros((F, C_PAD), f32)
    wf = wf.at[:, :H].set(params["w_gat"]).at[:, H:2 * H].set(params["w0"])
    wf = wf.at[:, 2 * H:2 * H + 1].set(w_ad)
    w1p = jnp.zeros((2 * H, C_PAD), f32).at[:, :H].set(params["w1"])
    w2p = jnp.zeros((H, C_PAD), f32).at[:, :C].set(params["w2"])
    wslab = jnp.concatenate([wf, w1p, w2p], axis=0).astype(bf16)             # (F+3H, 128)

    # Single f32 aux tile: att_src projection, all biases, adjacency mask, pooling mask.
    att_src_w = params["att_src"] @ params["w_gat"].T                        # (1, F)
    aux = jnp.zeros((8 + 2 * R, C_PAD), f32)
    aux = aux.at[0, :F].set(att_src_w[0])
    aux = aux.at[1, :H].set(params["b_gat"][0])
    aux = aux.at[2, :H].set(params["b0"][0])
    aux = aux.at[3, :H].set(params["b1"][0])
    aux = aux.at[4, :C].set(params["b2"][0])
    aux = aux.at[8:8 + N, :N].set(adj_add)
    aux = aux.at[8 + R:8 + R + G, :N].set(pmask)

    kernel = functools.partial(politifact_kernel, F=F, H=H, C=C, N=N, G=G, R=R)

    flops = int(2 * N * F * C_PAD            # fused x @ [W_gat|W0|w_ad]
                + 2 * N * F                  # att_src_w . x^T
                + 2 * N * N * H              # attn @ xw
                + 2 * G * N * H              # pooling matmul
                + 2 * (2 * N * H * C_PAD)    # lin1 (two split matmuls)
                + 2 * N * H * C_PAD)         # lin2
    transcendentals = int(N * N + N)
    bytes_accessed = int(N * F * 2 + wslab.size * 2 + aux.size * 4 + G * C_PAD * 4)

    out = pl.pallas_call(
        kernel,
        out_shape=jax.ShapeDtypeStruct((G, C_PAD), f32),
        in_specs=[pl.BlockSpec(memory_space=pltpu.MemorySpace.VMEM)] * 3,
        out_specs=pl.BlockSpec(memory_space=pltpu.MemorySpace.VMEM),
        compiler_params=pltpu.CompilerParams(vmem_limit_bytes=32 * 1024 * 1024),
        cost_estimate=pl.CostEstimate(flops=flops, transcendentals=transcendentals,
                                      bytes_accessed=bytes_accessed),
    )(x.astype(bf16), wslab, aux)
    return out[:, :C]


def reference_forward(x, edge_index, batch, params):
    """Plain-JAX f32 reference with the original module's semantics (masked max pooling)."""
    N = x.shape[0]
    G = N
    adj = jnp.zeros((N, N), jnp.float32)
    adj = adj.at[edge_index[1], edge_index[0]].set(1.0)
    adj = adj.at[jnp.arange(N), jnp.arange(N)].set(1.0)
    pmask = batch[None, :] == jnp.arange(G)[:, None]

    xw = x @ params["w_gat"]
    a_dst = (xw * params["att_dst"]).sum(-1, keepdims=True)
    a_src = (xw * params["att_src"]).sum(-1)[None, :]
    z = a_dst + a_src
    e = jnp.where(z >= 0, z, 0.2 * z)
    e = jnp.where(adj > 0, e, NEG_INF)
    attn = jax.nn.softmax(e, axis=-1)
    h_conv = jax.nn.relu(attn @ xw + params["b_gat"])
    h_pool = jnp.max(jnp.where(pmask[:, :, None], h_conv[None], NEG_INF), axis=1)
    h_lin = jax.nn.relu(x @ params["w0"] + params["b0"])
    h = jnp.concatenate([h_pool, h_lin], axis=1)
    h = jax.nn.relu(h @ params["w1"] + params["b1"])
    return h @ params["w2"] + params["b2"]


def init_params(key, in_channels, hidden_channels, out_channels):
    ks = jax.random.split(key, 8)
    s = 0.1
    return {
        # GATConv: lin weight pre-transposed to (F, H), attention vectors, bias
        "w_gat": s * jax.random.normal(ks[0], (in_channels, hidden_channels), jnp.float32),
        "att_src": s * jax.random.normal(ks[1], (1, hidden_channels), jnp.float32),
        "att_dst": s * jax.random.normal(ks[2], (1, hidden_channels), jnp.float32),
        "b_gat": s * jax.random.normal(ks[3], (1, hidden_channels), jnp.float32),
        # lin0: (F, H); lin1: (2H, H); lin2: (H, C) — all pre-transposed, biases as (1, out)
        "w0": s * jax.random.normal(ks[4], (in_channels, hidden_channels), jnp.float32),
        "b0": jnp.zeros((1, hidden_channels), jnp.float32),
        "w1": s * jax.random.normal(ks[5], (2 * hidden_channels, hidden_channels), jnp.float32),
        "b1": 0.01 * jnp.ones((1, hidden_channels), jnp.float32),
        "w2": s * jax.random.normal(ks[6], (hidden_channels, out_channels), jnp.float32),
        "b2": 0.01 * jnp.ones((1, out_channels), jnp.float32),
    }


if __name__ == "__main__":
    in_channels, hidden_channels, inter_channels, out_channels = 16, 32, 64, 4
    N = 8  # num_nodes == num_graphs (required by the reference model's cat)

    key = jax.random.PRNGKey(0)
    kx, kp = jax.random.split(key)
    x = jax.random.normal(kx, (N, in_channels), jnp.float32)

    # Bidirectional ring graph.
    src = jnp.array([0, 1, 2, 3, 4, 5, 6, 7, 1, 2, 3, 4, 5, 6, 7, 0], jnp.int32)
    dst = jnp.array([1, 2, 3, 4, 5, 6, 7, 0, 0, 1, 2, 3, 4, 5, 6, 7], jnp.int32)
    edge_index = jnp.stack([src, dst])
    batch = jnp.array([3, 1, 0, 2, 5, 4, 7, 6], jnp.int32)  # permutation of 0..N-1

    # Demo-only check of the model's structural assumption (off the forward hot path).
    # TODO(synk): enforcing the permutation assumption on the jit path needs a host sync.
    assert sorted(int(b) for b in batch) == list(range(N))

    params = init_params(kp, in_channels, hidden_channels, out_channels)

    out = politifact_forward(x, edge_index, batch, params)
    out = jax.block_until_ready(out)

    ref = reference_forward(x, edge_index, batch, params)
    assert out.shape == (N, out_channels)
    assert bool(jnp.all(jnp.isfinite(out)))
    # bf16 MXU inputs + approx reciprocal vs. a pure-f32 reference -> loose tolerance.
    assert jnp.allclose(out, ref, atol=2e-2, rtol=2e-2), (out, ref)

    print("KERNEL_OK")
</pallas_src>

<mosaic_0001>
module attributes {stable_mosaic.version = 11 : i64} {
  func.func @politifact_kernel(%arg0: memref<8x16xbf16, #tpu.memory_space<vmem>>, %arg1: memref<112x128xbf16, #tpu.memory_space<vmem>>, %arg2: memref<24x128xf32, #tpu.memory_space<vmem>>, %arg3: memref<8x128xf32, #tpu.memory_space<vmem>>) attributes {dimension_semantics = [], scalar_prefetch = 0 : i64, scratch_operands = 0 : i64, tpu.core_type = #tpu.core_type<tc>} {
    %c0 = arith.constant 0 : index
    %c0_0 = arith.constant 0 : index
    %0 = vector.load %arg0[%c0, %c0_0] : memref<8x16xbf16, #tpu.memory_space<vmem>>, vector<8x16xbf16>
    %c0_1 = arith.constant 0 : index
    %c0_2 = arith.constant 0 : index
    %1 = vector.load %arg2[%c0_1, %c0_2] : memref<24x128xf32, #tpu.memory_space<vmem>>, vector<24x128xf32>
    %2 = vector.extract_strided_slice %1 {offsets = [0, 0], sizes = [1, 16], strides = [1, 1]} : vector<24x128xf32> to vector<1x16xf32>
    %3 = arith.truncf %2 : vector<1x16xf32> to vector<1x16xbf16>
    %4 = vector.extract_strided_slice %1 {offsets = [1, 0], sizes = [1, 32], strides = [1, 1]} : vector<24x128xf32> to vector<1x32xf32>
    %5 = vector.extract_strided_slice %1 {offsets = [2, 0], sizes = [1, 32], strides = [1, 1]} : vector<24x128xf32> to vector<1x32xf32>
    %6 = vector.extract_strided_slice %1 {offsets = [3, 0], sizes = [1, 32], strides = [1, 1]} : vector<24x128xf32> to vector<1x32xf32>
    %7 = vector.extract_strided_slice %1 {offsets = [4, 0], sizes = [1, 128], strides = [1, 1]} : vector<24x128xf32> to vector<1x128xf32>
    %8 = vector.extract_strided_slice %1 {offsets = [8, 0], sizes = [8, 8], strides = [1, 1]} : vector<24x128xf32> to vector<8x8xf32>
    %9 = vector.extract_strided_slice %1 {offsets = [16, 0], sizes = [8, 8], strides = [1, 1]} : vector<24x128xf32> to vector<8x8xf32>
    %10 = arith.truncf %9 : vector<8x8xf32> to vector<8x8xbf16>
    %c0_3 = arith.constant 0 : index
    %c0_4 = arith.constant 0 : index
    %11 = vector.load %arg1[%c0_3, %c0_4] : memref<112x128xbf16, #tpu.memory_space<vmem>>, vector<16x128xbf16>
    %cst = arith.constant dense<0.000000e+00> : vector<8x128xf32>
    %12 = tpu.matmul %0, %11, %cst {dimension_numbers = #tpu.dot_dimension_numbers<[1], [0], [0], [1], [0, 0, 1, 1], [], []>} : vector<8x16xbf16>, vector<16x128xbf16>, vector<8x128xf32> -> vector<8x128xf32>
    %13 = vector.extract_strided_slice %12 {offsets = [0, 0], sizes = [8, 32], strides = [1, 1]} : vector<8x128xf32> to vector<8x32xf32>
    %14 = vector.extract_strided_slice %12 {offsets = [0, 32], sizes = [8, 32], strides = [1, 1]} : vector<8x128xf32> to vector<8x32xf32>
    %15 = vector.broadcast %5 : vector<1x32xf32> to vector<8x32xf32>
    %16 = arith.addf %14, %15 : vector<8x32xf32>
    %cst_5 = arith.constant 0.000000e+00 : f32
    %17 = vector.broadcast %cst_5 : f32 to vector<8x32xf32>
    %18 = arith.maximumf %16, %17 : vector<8x32xf32>
    %19 = vector.extract_strided_slice %12 {offsets = [0, 64], sizes = [8, 1], strides = [1, 1]} : vector<8x128xf32> to vector<8x1xf32>
    %cst_6 = arith.constant dense<0.000000e+00> : vector<1x8xf32>
    %20 = tpu.matmul %3, %0, %cst_6 {dimension_numbers = #tpu.dot_dimension_numbers<[1], [1], [0], [0], [0, 0, 1, 0], [], []>} : vector<1x16xbf16>, vector<8x16xbf16>, vector<1x8xf32> -> vector<1x8xf32>
    %21 = vector.broadcast %19 : vector<8x1xf32> to vector<8x8xf32>
    %22 = vector.broadcast %20 : vector<1x8xf32> to vector<8x8xf32>
    %23 = arith.addf %21, %22 : vector<8x8xf32>
    %cst_7 = arith.constant 0.000000e+00 : f32
    %24 = vector.broadcast %cst_7 : f32 to vector<8x8xf32>
    %25 = arith.cmpf oge, %23, %24 : vector<8x8xf32>
    %cst_8 = arith.constant 2.000000e-01 : f32
    %26 = vector.broadcast %cst_8 : f32 to vector<8x8xf32>
    %27 = arith.mulf %26, %23 : vector<8x8xf32>
    %28 = arith.select %25, %23, %27 : vector<8x8xi1>, vector<8x8xf32>
    %29 = arith.addf %28, %8 : vector<8x8xf32>
    %cst_9 = arith.constant dense<0xFF800000> : vector<8xf32>
    %30 = vector.multi_reduction <maximumf>, %29, %cst_9 [1] : vector<8x8xf32> to vector<8xf32>
    %31 = vector.shape_cast %30 : vector<8xf32> to vector<8x1xf32>
    %32 = vector.broadcast %31 : vector<8x1xf32> to vector<8x8xf32>
    %33 = arith.subf %29, %32 : vector<8x8xf32>
    %34 = math.exp %33 : vector<8x8xf32>
    %cst_10 = arith.constant dense<0.000000e+00> : vector<8xf32>
    %35 = vector.multi_reduction <add>, %34, %cst_10 [1] : vector<8x8xf32> to vector<8xf32>
    %36 = vector.shape_cast %35 : vector<8xf32> to vector<8x1xf32>
    %37 = tpu.reciprocal %36 {approx = true} : vector<8x1xf32> -> vector<8x1xf32>
    %38 = vector.broadcast %37 : vector<8x1xf32> to vector<8x8xf32>
    %39 = arith.mulf %34, %38 : vector<8x8xf32>
    %40 = arith.truncf %39 : vector<8x8xf32> to vector<8x8xbf16>
    %41 = arith.truncf %13 : vector<8x32xf32> to vector<8x32xbf16>
    %cst_11 = arith.constant dense<0.000000e+00> : vector<8x32xf32>
    %42 = tpu.matmul %40, %41, %cst_11 {dimension_numbers = #tpu.dot_dimension_numbers<[1], [0], [0], [1], [0, 0, 1, 1], [], []>} : vector<8x8xbf16>, vector<8x32xbf16>, vector<8x32xf32> -> vector<8x32xf32>
    %43 = vector.broadcast %4 : vector<1x32xf32> to vector<8x32xf32>
    %44 = arith.addf %42, %43 : vector<8x32xf32>
    %cst_12 = arith.constant 0.000000e+00 : f32
    %45 = vector.broadcast %cst_12 : f32 to vector<8x32xf32>
    %46 = arith.maximumf %44, %45 : vector<8x32xf32>
    %47 = arith.truncf %46 : vector<8x32xf32> to vector<8x32xbf16>
    %cst_13 = arith.constant dense<0.000000e+00> : vector<8x32xf32>
    %48 = tpu.matmul %10, %47, %cst_13 {dimension_numbers = #tpu.dot_dimension_numbers<[1], [0], [0], [1], [0, 0, 1, 1], [], []>} : vector<8x8xbf16>, vector<8x32xbf16>, vector<8x32xf32> -> vector<8x32xf32>
    %49 = arith.truncf %48 : vector<8x32xf32> to vector<8x32xbf16>
    %c16 = arith.constant 16 : index
    %c0_14 = arith.constant 0 : index
    %50 = vector.load %arg1[%c16, %c0_14] : memref<112x128xbf16, #tpu.memory_space<vmem>>, vector<32x128xbf16>
    %cst_15 = arith.constant dense<0.000000e+00> : vector<8x128xf32>
    %51 = tpu.matmul %49, %50, %cst_15 {dimension_numbers = #tpu.dot_dimension_numbers<[1], [0], [0], [1], [0, 0, 1, 1], [], []>} : vector<8x32xbf16>, vector<32x128xbf16>, vector<8x128xf32> -> vector<8x128xf32>
    %52 = arith.truncf %18 : vector<8x32xf32> to vector<8x32xbf16>
    %c48 = arith.constant 48 : index
    %c0_16 = arith.constant 0 : index
    %53 = vector.load %arg1[%c48, %c0_16] : memref<112x128xbf16, #tpu.memory_space<vmem>>, vector<32x128xbf16>
    %cst_17 = arith.constant dense<0.000000e+00> : vector<8x128xf32>
    %54 = tpu.matmul %52, %53, %cst_17 {dimension_numbers = #tpu.dot_dimension_numbers<[1], [0], [0], [1], [0, 0, 1, 1], [], []>} : vector<8x32xbf16>, vector<32x128xbf16>, vector<8x128xf32> -> vector<8x128xf32>
    %55 = arith.addf %51, %54 : vector<8x128xf32>
    %56 = vector.extract_strided_slice %55 {offsets = [0, 0], sizes = [8, 32], strides = [1, 1]} : vector<8x128xf32> to vector<8x32xf32>
    %57 = vector.broadcast %6 : vector<1x32xf32> to vector<8x32xf32>
    %58 = arith.addf %56, %57 : vector<8x32xf32>
    %cst_18 = arith.constant 0.000000e+00 : f32
    %59 = vector.broadcast %cst_18 : f32 to vector<8x32xf32>
    %60 = arith.maximumf %58, %59 : vector<8x32xf32>
    %61 = arith.truncf %60 : vector<8x32xf32> to vector<8x32xbf16>
    %c80 = arith.constant 80 : index
    %c0_19 = arith.constant 0 : index
    %62 = vector.load %arg1[%c80, %c0_19] : memref<112x128xbf16, #tpu.memory_space<vmem>>, vector<32x128xbf16>
    %cst_20 = arith.constant dense<0.000000e+00> : vector<8x128xf32>
    %63 = tpu.matmul %61, %62, %cst_20 {dimension_numbers = #tpu.dot_dimension_numbers<[1], [0], [0], [1], [0, 0, 1, 1], [], []>} : vector<8x32xbf16>, vector<32x128xbf16>, vector<8x128xf32> -> vector<8x128xf32>
    %64 = vector.broadcast %7 : vector<1x128xf32> to vector<8x128xf32>
    %65 = arith.addf %63, %64 : vector<8x128xf32>
    %c0_21 = arith.constant 0 : index
    %c0_22 = arith.constant 0 : index
    %66 = vector.load %arg3[%c0_21, %c0_22] : memref<8x128xf32, #tpu.memory_space<vmem>>, vector<8x128xf32>
    tpu.vector_store %arg3[%c0_21, %c0_22], %65 {strides = array<i32>} : memref<8x128xf32, #tpu.memory_space<vmem>>, vector<8x128xf32>,
    return
  }
}

</mosaic_0001>

<bundles_post_ra>
// kernel: tpu_custom_call.1
= control target key start
LH: loop header
LB: loop body
LE: loop exit
PB: predicated region body
PF: predicated region fallthrough
CT: control target
= control target key end

     0   :  { %8 = vsyncpa [#allocation3], 0  ;;  %s787_s0 = inlined_call_operand.hbm [shape: bf16[8,16], index: 0, kind: input, shape index: {}]   ;;  %s788_s1 = inlined_call_operand.hbm [shape: bf16[112,128], index: 1, kind: input, shape index: {}]   ;;  %s789_s2 = inlined_call_operand.hbm [shape: f32[24,128], index: 2, kind: input, shape index: {}]   ;;  %s790_s3 = inlined_call_operand.hbm [shape: f32[8,128], index: 3, kind: output, shape index: {}]  }
   0x1   :  { %9 = vsyncpa [#allocation6], 0 }
   0x2   :  { %10 = vsyncpa [#allocation4], 0  ;;  %s694_s12 = smov [#allocation5]  }
   0x3   :  { %s26_s13 = sshll.u32 %s694_s12, 4  ;;  %s27_s13 = int_to_ptr.vmem [resolvable:$true] %s26_s13 }
   0x4   :  { %s616_s14 = scalar_lea.vmem %s27_s13, 896  ;;  %p621_p1 = scmp.lt.s32.totalorder %s27_s13, %s27_s13 }
   0x5   :  { %p617_p0 = scmp.ne.s32.totalorder %s27_s13, %s616_s14  ;;  %p622_p2 = scmp.lt.s32.totalorder %s616_s14, %s616_s14 }
   0x7   :  { %p623_p3 = por %p622_p2, %p621_p1 }
   0x9   :  { %p624_p4 = pnand %p623_p3, %p617_p0 }
   0xb   :  { %627 = shalt.err (!%p624_p4)
}
   0xc   :  { %s695_s15 = smov 64   ;;  %s696_s16 = smov 4  }
   0xd   :  { %32 = dma.hbm_to_vmem [thread:$0]  %s788_s1, 896, %s27_s13, [#allocation6], %s695_s15, %s695_s15, %s696_s16  }
   0xe   :  { %s697_s19 = smov [#allocation2]   ;;  %s698_s21 = smov [#allocation7]  }
   0xf   :  { %s17_s20 = sshll.u32 %s697_s19, 4  ;;  %s38_s22 = sshll.u32 %s698_s21, 4  ;;  %s18_s20 = int_to_ptr.vmem [resolvable:$true] %s17_s20  ;;  %s39_s22 = int_to_ptr.vmem [resolvable:$true] %s38_s22 }
  0x10   :  { %s636_s23 = scalar_lea.vmem %s18_s20, 64  ;;  %p641_p6 = scmp.lt.s32.totalorder %s18_s20, %s18_s20 }
  0x11   :  { %p637_p5 = scmp.ne.s32.totalorder %s18_s20, %s636_s23  ;;  %p642_p7 = scmp.lt.s32.totalorder %s636_s23, %s636_s23 }
  0x13   :  { %p643_p8 = por %p642_p7, %p641_p6 }
  0x15   :  { %p644_p9 = pnand %p643_p8, %p637_p5 }
  0x17   :  { %647 = shalt.err (!%p644_p9)
}
  0x18   :  { %20 = dma.hbm_to_vmem [thread:$0]  %s787_s0, 64, %s18_s20, [#allocation3]  }
  0x19   :  { %s656_s26 = scalar_lea.vmem %s39_s22, 384  ;;  %p661_p11 = scmp.lt.s32.totalorder %s39_s22, %s39_s22 }
  0x1a   :  { %p657_p10 = scmp.ne.s32.totalorder %s39_s22, %s656_s26  ;;  %p662_p12 = scmp.lt.s32.totalorder %s656_s26, %s656_s26 }
  0x1c   :  { %p663_p13 = por %p662_p12, %p661_p11 }
  0x1e   :  { %p664_p0 = pnand %p663_p13, %p657_p10 }
  0x20   :  { %667 = shalt.err (!%p664_p0)
}
  0x21   :  { %s699_s1 = smov 128   ;;  %s700_s27 = smov 8  }
  0x22   :  { %44 = dma.hbm_to_vmem [thread:$0]  %s789_s2, 384, %s39_s22, [#allocation6], %s699_s1, %s699_s1, %s700_s27  }
  0x23   :  { %688 = dma.done.wait [#allocation3], 64  }
  0x24   :  { %689 = vsyncadd [#allocation3], 4294967232 }
  0x25   :  { %690 = dma.done.wait [#allocation6], 1280  }
  0x26   :  { %691 = vsyncadd [#allocation6], 4294966016  ;;  %v701_v0 = vmov 0.0   ;;  %vm702_vm0 = vmmov 0   ;;  %v703_v1 = vmov 64   ;;  %v597_v2 = vld [vmem:[#allocation5] sm:$0xff]   ;;  %v113_v17 = vlaneseq }
  0x27   :  { %535 = vmatprep.subr.bf16.mxu0 %v701_v0  ;;  %537 = vmatprep.mubr.msk.bf16.mxu0 %vm702_vm0, %v701_v0  ;;  %v55_v3 = vld [vmem:[#allocation2] sm:$0xf]  ;;  %vm69_vm1 = vcmask 130048   ;;  %vm201_vm2 = vcmask 1043456   ;;  %v57_v24 = vld [vmem:[#allocation7 + $0x8] sm:$0xff]  ;;  %vm180_vm4 = vcmask 64512  }
  0x28   :  { %541 = vmatprep.subr.bf16.mxu1 %v701_v0  ;;  %543 = vmatprep.mubr.msk.bf16.mxu1 %vm702_vm0, %v701_v0  ;;  %v71_v4 = vsel %vm69_vm1, %v55_v3, 0  ;;  %v742_v5 = vld [vmem:[#allocation7] sm:$0xff]  ;;  %v754_v18 = vshrl.u32 %v113_v17, 7  ;;  %s704_s0 = smov 32   ;;  %s705_s2 = smov 96   ;;  %v598_v42 = vld [vmem:[#allocation5 + $0x20] sm:$0xff]  }
  0x29   :  { %596 = vset.pattern.permute.xlu0 %v703_v1  ;;  %536 = vmatpush3.bf16.msra.mxu0 %v597_v2  ;;  %v59_v6 = vpack.c.bf16 %v742_v5, %v742_v5  ;;  %v599_v44 = vld [vmem:[#allocation5 + $0x18] sm:$0xff]   ;;  %vm318_vm5 = vcmask 261120   ;;  %v58_v53 = vld [vmem:[#allocation7 + $0x10] sm:$0xff]  ;;  %v600_v58 = vld [vmem:[#allocation5 + $0x10] sm:$0xff]   ;;  %s706_s30 = smov [#allocation8]  }
  0x2a   :  { %542 = vmatpush3.bf16.xpose.msra.mxu1 %v71_v4  ;;  %547 = vmatprep.subr.bf16.mxu0 %v701_v0  ;;  %v173_v19 = vsub.s32 0, %v754_v18  ;;  %v115_v33 = vsub.s32 2, %v754_v18  ;;  %v196_v46 = vsub.s32 1, %v754_v18  ;;  %v60_v57 = vpack.c.bf16 %v58_v53, %v58_v53  ;;  %v601_v59 = vld [vmem:[#allocation5 + $0x8] sm:$0xff]   ;;  %s494_s4 = sshll.u32 %s706_s30, 4  ;;  %s495_s4 = int_to_ptr.vmem [resolvable:$true] %s494_s4 }
  0x2b   :  { %553 = vmatprep.subr.bf16.mxu1 %v701_v0  ;;  %s668_s5 = scalar_lea.vmem %s495_s4, 128  ;;  %p673_p2 = scmp.lt.s32.totalorder %s495_s4, %s495_s4 }
  0x2c   :  { %538 = vmatmul.mubr.msk.bf16.vlgmr.msra.gmra.mxu0 %vm69_vm1, %v55_v3  ;;  %v116_v34 = vrot.slane %v742_v5, %v115_v33  ;;  %v197_v47 = vrot.slane %v742_v5, %v196_v46  ;;  %p669_p1 = scmp.ne.s32.totalorder %s495_s4, %s668_s5  ;;  %p674_p3 = scmp.lt.s32.totalorder %s668_s5, %s668_s5 }
  0x2d   :  { %549 = vmatprep.mubr.msk.bf16.mxu0 %vm702_vm0, %v701_v0 }
  0x2e   :  { %p675_p4 = por %p674_p3, %p673_p2 }
  0x30   :  { %p676_p5 = pnand %p675_p4, %p669_p1 }
  0x31   :  { %544 = vmatmul.mubr.msk.bf16.vlgmr.msra.gmra.mxu1 %vm69_vm1, %v59_v6 }
  0x32   :  { %555 = vmatprep.mubr.msk.bf16.mxu1 %vm702_vm0, %v701_v0 }
  0xec   :  { %v107_v7 = vpop.f32.mrf.mxu0 }
  0xed   :  { %v193_v8 = vpack.c.bf16 %v107_v7, %v107_v7  ;;  %168 = vperm.xlu0 %596, %v107_v7  }
  0xee   :  { %v539_v9 = vpop.f32.mrf.mxu0 }
  0xef   :  { %v203_v10 = vsel %vm201_vm2, %v193_v8, 0  ;;  %v603_v8 = vld [vmem:[#allocation5 + $0x28] sm:$0xff]   ;;  %v419_v9 = vsub.s32 3, %v754_v18 }
  0xf0   :  { %v110_v11 = vpop.f32.mrf.mxu0  ;;  %548 = vmatpush3.bf16.msra.mxu0 %v203_v10 }
  0xf1   :  { %v160_v12 = vpop.f32.mrf.mxu1  ;;  %559 = vmatprep.subr.bf16.mxu0 %v701_v0  ;;  %v420_v10 = vrot.slane %v742_v5, %v419_v9 }
  0xf2   :  { %v540_v13 = vpop.f32.mrf.mxu0  ;;  %v174_v20 = vrot.slane %v160_v12, %v173_v19 }
  0xf3   :  { %v545_v14 = vpop.f32.mrf.mxu1 }
  0xf5   :  { %v163_v15 = vpop.f32.mrf.mxu1 }
  0xf7   :  { %v546_v16 = vpop.f32.mrf.mxu1 }
 0x168   :  { %v169_v21 = vpop.permute.xlu0 %168 }
 0x169   :  { %v175_v22 = vadd.f32 %v174_v20, %v169_v21  ;;  %v430_v20 = vsub.s32 4, %v754_v18 }
 0x16b   :  { %vm176_vm3 = vcmp.ge.f32.partialorder %v175_v22, 0.0  ;;  %v177_v23 = vmul.f32 0.2, %v175_v22 }
 0x16d   :  { %v178_v25 = vsel %vm176_vm3, %v175_v22, %v177_v23 }
 0x16e   :  { %v179_v26 = vadd.f32 %v178_v25, %v57_v24 }
 0x170   :  { %v181_v27 = vsel %vm180_vm4, %v179_v26, -inf }
 0x171   :  { %182 = vmax.xlane.f32.xlu0 %v181_v27 }
 0x1fa   :  { %v183_v28 = vpop.xlane.xlu0 %182 }
 0x1fb   :  { %v184_v29 = vsub.f32 %v179_v26, %v183_v28 }
 0x1fd   :  { %v185_v30 = vmul.f32 1.442695, %v184_v29 }
 0x1ff   :  { %604 = vpow2.f32 %v185_v30 }
 0x20c   :  { %v605_v31 = vpop.eup %604 }
 0x20d   :  { %v187_v32 = vsel %vm180_vm4, %v605_v31, 0.0 }
 0x20e   :  { %188 = vadd.xlane.f32.xlu1 %v187_v32 }
 0x21f   :  { %118 = vrot.lane.b32.xlu1 %v116_v34, %s704_s0 }
 0x297   :  { %v189_v35 = vpop.xlane.xlu1 %188 }
 0x298   :  { %606 = vrcp.f32 %v189_v35 }
 0x29b   :  { %v119_v36 = vpop.permute.xlu1 %118 }
 0x29c   :  { %v121_v37 = vadd.f32 %v119_v36, %v107_v7  ;;  %v602_v7 = vld [vmem:[#allocation5 + $0x30] sm:$0xff]  }
 0x29e   :  { %v122_v38 = vmax.f32 %v121_v37, 0.0 }
 0x2a0   :  { %v298_v39 = vpack.c.bf16 %v122_v38, %v122_v38 }
 0x2a2   :  { %304 = vrot.lane.b32.xlu1 %v298_v39, %s705_s2 }
 0x2a5   :  { %v607_v40 = vpop.eup %606 }
 0x2a6   :  { %v191_v41 = vmul.f32 %v607_v40, %v605_v31 }
 0x2a8   :  { %v192_v43 = vpack.c.bf16 %v191_v41, %v191_v41 }
 0x2aa   :  { %550 = vmatmul.mubr.msk.bf16.vlgmr.msra.gmra.mxu0 %vm180_vm4, %v192_v43 }
 0x2ab   :  { %560 = vmatpush3.bf16.msra.mxu0 %v598_v42  ;;  %563 = vmatprep.mubr.msk.bf16.mxu0 %vm702_vm0, %v701_v0 }
 0x2ac   :  { %561 = vmatprep.subr.bf16.mxu0 %v701_v0 }
 0x2af   :  { %562 = vmatpush3.bf16.msra.mxu0 %v599_v44 }
 0x2b0   :  { %575 = vmatprep.subr.bf16.mxu0 %v701_v0 }
 0x314   :  { %v305_v45 = vpop.permute.xlu1 %304 }
 0x315   :  { %564 = vmatmul.mubr.msk.bf16.vlgmr.msra.gmra.mxu0 %vm318_vm5, %v305_v45 }
 0x316   :  { %579 = vmatprep.mubr.msk.bf16.mxu0 %vm702_vm0, %v701_v0  ;;  %576 = vmatpush3.bf16.msra.mxu0 %v602_v7 }
 0x317   :  { %577 = vmatprep.subr.bf16.mxu0 %v701_v0 }
 0x31a   :  { %578 = vmatpush3.bf16.msra.mxu0 %v603_v8 }
 0x36a   :  { %v239_v48 = vpop.f32.mrf.mxu0 }
 0x36b   :  { %v240_v49 = vadd.f32 %v239_v48, %v197_v47 }
 0x36c   :  { %v551_v50 = vpop.f32.mrf.mxu0 }
 0x36d   :  { %v245_v51 = vmax.f32 %v240_v49, 0.0 }
 0x36e   :  { %v242_v52 = vpop.f32.mrf.mxu0 }
 0x36f   :  { %v246_v54 = vpack.c.bf16 %v245_v51, %v245_v51 }
 0x370   :  { %v552_v55 = vpop.f32.mrf.mxu0 }
 0x371   :  { %v251_v56 = vsel %vm201_vm2, %v246_v54, 0 }
 0x372   :  { %554 = vmatpush3.bf16.msra.mxu1 %v251_v56 }
 0x373   :  { %567 = vmatprep.subr.bf16.mxu1 %v701_v0 }
 0x375   :  { %556 = vmatmul.mubr.msk.bf16.vlgmr.msra.gmra.mxu1 %vm180_vm4, %v60_v57 }
 0x376   :  { %568 = vmatpush3.bf16.msra.mxu1 %v600_v58  ;;  %571 = vmatprep.mubr.msk.bf16.mxu1 %vm702_vm0, %v701_v0 }
 0x377   :  { %569 = vmatprep.subr.bf16.mxu1 %v701_v0  ;;  %v431_v0 = vrot.slane %v742_v5, %v430_v20 }
 0x37a   :  { %570 = vmatpush3.bf16.msra.mxu1 %v601_v59 }
 0x3d5   :  { %v356_v60 = vpop.f32.mrf.mxu0 }
 0x3d7   :  { %v565_v61 = vpop.f32.mrf.mxu0 }
 0x3d9   :  { %v359_v62 = vpop.f32.mrf.mxu0 }
 0x3db   :  { %v566_v63 = vpop.f32.mrf.mxu0 }
 0x435   :  { %v287_v1 = vpop.f32.mrf.mxu1 }
 0x436   :  { %v293_v2 = vpack.c.bf16 %v287_v1, %v287_v1 }
 0x437   :  { %v557_v3 = vpop.f32.mrf.mxu1 }
 0x438   :  { %572 = vmatmul.mubr.msk.bf16.vlgmr.msra.gmra.mxu1 %vm318_vm5, %v293_v2 }
 0x439   :  { %v290_v4 = vpop.f32.mrf.mxu1 }
 0x43b   :  { %v558_v6 = vpop.f32.mrf.mxu1 }
 0x4f8   :  { %v411_v11 = vpop.f32.mrf.mxu1 }
 0x4f9   :  { %v412_v12 = vadd.f32 %v411_v11, %v356_v60 }
 0x4fa   :  { %v573_v13 = vpop.f32.mrf.mxu1 }
 0x4fb   :  { %v421_v14 = vadd.f32 %v420_v10, %v412_v12 }
 0x4fc   :  { %v414_v15 = vpop.f32.mrf.mxu1 }
 0x4fd   :  { %v422_v16 = vmax.f32 %v421_v14, 0.0 }
 0x4fe   :  { %v574_v17 = vpop.f32.mrf.mxu1 }
 0x4ff   :  { %v423_v19 = vpack.c.bf16 %v422_v16, %v422_v16 }
 0x501   :  { %580 = vmatmul.mubr.msk.bf16.vlgmr.msra.gmra.mxu0 %vm318_vm5, %v423_v19 }
 0x5c1   :  { %v481_v21 = vpop.f32.mrf.mxu0 }
 0x5c2   :  { %v482_v22 = vadd.f32 %v481_v21, %v431_v0 }
 0x5c3   :  { %v581_v23 = vpop.f32.mrf.mxu0 }
 0x5c4   :  { %487 = vst [vmem:[#allocation8] sm:$0xff] %v482_v22 }
 0x5c5   :  { %v484_v24 = vpop.f32.mrf.mxu0 }
 0x5c6   :  { %679 = shalt.err (!%p676_p5)
}
 0x5c7   :  { %497 = dma.vmem_to_hbm [thread:$0]  %s495_s4, 128, %s790_s3, [#allocation4]   ;;  %v582_v5 = vpop.f32.mrf.mxu0 }
 0x5c8   :  { %692 = dma.done.wait [#allocation4], 128  }
 0x5c9   :  { %693 = vsyncadd [#allocation4], 4294967168 }
 0x5ca   :  { %501 = vsyncpa [#allocation3], 1 }
 0x5cb   :  { %502 = vsyncpa [#allocation6], 1 }
 0x5cc   :  { %503 = vsyncpa [#allocation4], 1 }

</bundles_post_ra>
